<compile_context>
chip_gen: v6e
topology: v6e:2x2x1
jax: 0.10.0
libtpu: 0.0.40
codegen_flags: <defaults>
</compile_context>

<pallas_src>
import math

import jax
import jax.numpy as jnp
from jax import lax
from jax.experimental import pallas as pl
from jax.experimental.pallas import tpu as pltpu


def _round_up(x, m):
    return ((x + m - 1) // m) * m


def _default_vmem_limit():
    """Generation-aware scoped VMEM limit."""
    try:
        kind = jax.devices()[0].device_kind.lower()
    except Exception:  # pragma: no cover - defensive
        kind = ""
    if any(tag in kind for tag in ("v4", "v5", "v6")):
        return 96 * 1024 * 1024      # 128 MiB physical VMEM on these gens
    return 48 * 1024 * 1024          # v7x: 64 MiB per TensorCore, stay under


def _stage2_geometry(n, row_tile, k_tile):
    """Clamp tiles and derive independent row/col padding (no lcm blow-up)."""
    k_tile = max(128, min(_round_up(k_tile, 128), _round_up(n, 128)))
    row_tile = max(16, min(_round_up(row_tile, 16), _round_up(n, 16)))
    # v7x has 2 TensorCores: make sure the "parallel" row axis has >= 2 tiles
    # once the graph is big enough to split.
    if n > 128 and _round_up(n, row_tile) // row_tile < 2:
        row_tile = _round_up(-(-n // 2), 16)
    n_row_pad = _round_up(n, row_tile)
    n_col_pad = _round_up(n, k_tile)
    return row_tile, k_tile, n_row_pad, n_col_pad


def _bias_row(bias, fout, fout_pad):
    if bias is None:
        return jnp.zeros((1, fout_pad), jnp.float32)
    b = jnp.asarray(bias, jnp.float32).reshape(1, fout)
    return jnp.pad(b, ((0, 0), (0, fout_pad - fout)))


# ---------------------------------------------------------------------------
# Kernels
# ---------------------------------------------------------------------------
def _make_stage1_kernel(precision):
    """support = x @ weight, K(fin)-tiled with an f32 accumulator."""
    def kernel(x_ref, w_ref, s_ref, acc_ref):
        k = pl.program_id(1)

        @pl.when(k == 0)
        def _():
            acc_ref[...] = jnp.zeros_like(acc_ref)

        acc_ref[...] += jnp.dot(
            x_ref[...], w_ref[...],
            preferred_element_type=jnp.float32, precision=precision)

        @pl.when(k == pl.num_programs(1) - 1)
        def _():
            s_ref[...] = acc_ref[...].astype(s_ref.dtype)

    return kernel


def _make_stage2_kernel(*, resident_support, k_tile, use_acc, precision):
    """out = adj @ support + bias, rows parallel, K (N) innermost."""
    def kernel(adj_ref, s_ref, b_ref, o_ref, *scratch):
        k = pl.program_id(1)

        if resident_support:
            start = pl.multiple_of(k * k_tile, k_tile)
            s_blk = s_ref[pl.ds(start, k_tile), :]
        else:
            s_blk = s_ref[...]

        part = jnp.dot(adj_ref[...], s_blk,
                       preferred_element_type=jnp.float32, precision=precision)

        if use_acc:
            acc_ref = scratch[0]

            @pl.when(k == 0)
            def _():
                acc_ref[...] = jnp.zeros_like(acc_ref)

            acc_ref[...] += part

            @pl.when(k == pl.num_programs(1) - 1)
            def _():
                o_ref[...] = (acc_ref[...] + b_ref[...]).astype(o_ref.dtype)
        else:
            # f32 output: accumulate directly into the k-resident output block.
            @pl.when(k == 0)
            def _():
                o_ref[...] = jnp.zeros_like(o_ref) + b_ref[...]

            o_ref[...] += part

    return kernel


def _fused_kernel(x_ref, adj_ref, w_ref, b_ref, o_ref):
    """Small-graph fast path: both matmuls + bias in one single-block kernel."""
    support = jnp.dot(x_ref[...], w_ref[...],
                      preferred_element_type=jnp.float32,
                      precision=lax.Precision.HIGHEST)
    out = jnp.dot(adj_ref[...], support,
                  preferred_element_type=jnp.float32,
                  precision=lax.Precision.HIGHEST)
    o_ref[...] = (out + b_ref[...]).astype(o_ref.dtype)


# ---------------------------------------------------------------------------
# Wrappers
# ---------------------------------------------------------------------------
def prepare_adjacency(adj, *, row_tile=512, k_tile=512, dtype=jnp.bfloat16):
    """Pad + cast adjacency once (reuse across layers / steps).

    Must be called with the same row_tile / k_tile / matmul_dtype that will be
    passed to graph_convolution.
    """
    n = adj.shape[0]
    assert adj.shape == (n, n), "adjacency must be square"
    row_tile, k_tile, n_row_pad, n_col_pad = _stage2_geometry(n, row_tile, k_tile)
    return jnp.pad(adj.astype(dtype), ((0, n_row_pad - n), (0, n_col_pad - n)))


def _fused_forward(x, adj, weight, bias, vmem_limit):
    n, fin = x.shape
    fout = weight.shape[1]
    out_dtype = x.dtype
    n_pad = _round_up(n, 8)
    fout_pad = _round_up(fout, 128)

    xp = jnp.pad(x.astype(jnp.float32), ((0, n_pad - n), (0, 0)))
    adjp = jnp.pad(adj.astype(jnp.float32), ((0, n_pad - n), (0, n_pad - n)))
    wp = jnp.pad(weight.astype(jnp.float32), ((0, 0), (0, fout_pad - fout)))
    bp = _bias_row(bias, fout, fout_pad)

    out = pl.pallas_call(
        _fused_kernel,
        out_shape=jax.ShapeDtypeStruct((n_pad, fout_pad), out_dtype),
        grid_spec=pltpu.PrefetchScalarGridSpec(
            num_scalar_prefetch=0,
            grid=(1,),
            in_specs=[
                pl.BlockSpec((n_pad, fin), lambda i: (0, 0)),
                pl.BlockSpec((n_pad, n_pad), lambda i: (0, 0)),
                pl.BlockSpec((fin, fout_pad), lambda i: (0, 0)),
                pl.BlockSpec((1, fout_pad), lambda i: (0, 0)),
            ],
            out_specs=pl.BlockSpec((n_pad, fout_pad), lambda i: (0, 0)),
        ),
        compiler_params=pltpu.CompilerParams(
            dimension_semantics=("arbitrary",),
            vmem_limit_bytes=min(vmem_limit, 32 * 1024 * 1024),
        ),
        cost_estimate=pl.CostEstimate(
            flops=2 * n_pad * fin * fout_pad + 2 * n_pad * n_pad * fout_pad,
            transcendentals=0,
            bytes_accessed=int(4 * (n_pad * n_pad + n_pad * fin
                                    + fin * fout_pad + n_pad * fout_pad)),
        ),
    )(xp, adjp, wp, bp)
    return out[:n, :fout]


def graph_convolution(x, adj, weight, bias=None, *,
                      row_tile=512, k_tile=512,
                      matmul_dtype=jnp.bfloat16,
                      allow_fused=True,
                      vmem_limit_bytes=None):
    """Pallas GCN layer: adj @ (x @ weight) + bias.

    adj may be the raw (N, N) matrix, or the pre-padded/cast array returned by
    prepare_adjacency (same row_tile / k_tile / matmul_dtype) to avoid the
    per-call N^2 pad+cast.
    """
    n, fin = x.shape
    fin_w, fout = weight.shape
    assert fin_w == fin, "weight rows must match input features"

    out_dtype = x.dtype
    mm_dtype = jnp.dtype(matmul_dtype)
    mm_isz = mm_dtype.itemsize
    out_isz = jnp.dtype(out_dtype).itemsize
    fout_pad = _round_up(fout, 128)
    vmem_limit = (vmem_limit_bytes if vmem_limit_bytes is not None
                  else _default_vmem_limit())

    row_tile, k_tile, n_row_pad, n_col_pad = _stage2_geometry(n, row_tile, k_tile)

    adj_prepadded = (adj.shape == (n_row_pad, n_col_pad) and adj.dtype == mm_dtype)
    if not adj_prepadded and adj.shape != (n, n):
        raise ValueError(
            f"adj must be ({n},{n}) or pre-padded ({n_row_pad},{n_col_pad}) "
            f"{mm_dtype}, got {adj.shape} {adj.dtype}")

    # ---- small-graph fast path: one fused single-block kernel -------------
    if allow_fused and not adj_prepadded:
        n8 = _round_up(n, 8)
        fused_bytes = 4 * (n8 * n8 + n8 * fin + fin * fout_pad
                           + 2 * n8 * fout_pad + fout_pad)
        if fused_bytes <= 8 * 1024 * 1024:
            return _fused_forward(x, adj, weight, bias, vmem_limit)

    # ---- stage 1: support = x @ weight (f32 inputs, K(fin)-tiled) ----------
    fin_tile = fin if fin <= 2048 else 512
    fin_pad = _round_up(fin, fin_tile)
    s1_row = 256 if k_tile % 256 == 0 else 128   # must divide n_col_pad

    xp = jnp.pad(x.astype(jnp.float32),
                 ((0, n_col_pad - n), (0, fin_pad - fin)))
    wp = jnp.pad(weight.astype(jnp.float32),
                 ((0, fin_pad - fin), (0, fout_pad - fout)))

    support = pl.pallas_call(
        _make_stage1_kernel(lax.Precision.HIGHEST),
        out_shape=jax.ShapeDtypeStruct((n_col_pad, fout_pad), mm_dtype),
        grid_spec=pltpu.PrefetchScalarGridSpec(
            num_scalar_prefetch=0,
            grid=(n_col_pad // s1_row, fin_pad // fin_tile),
            in_specs=[
                pl.BlockSpec((s1_row, fin_tile), lambda i, k: (i, k)),
                pl.BlockSpec((fin_tile, fout_pad), lambda i, k: (k, 0)),
            ],
            out_specs=pl.BlockSpec((s1_row, fout_pad), lambda i, k: (i, 0)),
            scratch_shapes=[pltpu.VMEM((s1_row, fout_pad), jnp.float32)],
        ),
        compiler_params=pltpu.CompilerParams(
            dimension_semantics=("parallel", "arbitrary"),
            vmem_limit_bytes=vmem_limit,
        ),
        cost_estimate=pl.CostEstimate(
            flops=2 * n_col_pad * fin_pad * fout_pad,
            transcendentals=0,
            bytes_accessed=int(4 * (n_col_pad * fin_pad + fin_pad * fout_pad)
                               + mm_isz * n_col_pad * fout_pad),
        ),
    )(xp, wp)

    # ---- stage 2: out = adj @ support + bias --------------------------------
    if adj_prepadded:
        adjp = adj
    else:
        adjp = jnp.pad(adj.astype(mm_dtype),
                       ((0, n_row_pad - n), (0, n_col_pad - n)))
    bp = _bias_row(bias, fout, fout_pad)

    n_row_tiles = n_row_pad // row_tile
    n_k_tiles = n_col_pad // k_tile
    use_acc = out_dtype != jnp.float32

    # Keep support fully resident in VMEM when it (conservatively counted as
    # double-buffered) plus the adj / out tiles fit the per-generation budget.
    resident_bytes = (2 * n_col_pad * fout_pad * mm_isz        # support x2
                      + 2 * row_tile * k_tile * mm_isz         # adj tiles x2
                      + 2 * row_tile * fout_pad * out_isz      # out tiles x2
                      + (row_tile * fout_pad * 4 if use_acc else 0))
    resident = resident_bytes <= int(0.7 * vmem_limit)

    if resident:
        support_spec = pl.BlockSpec((n_col_pad, fout_pad), lambda i, k: (0, 0))
        support_reads = 1
    else:
        support_spec = pl.BlockSpec((k_tile, fout_pad), lambda i, k: (k, 0))
        support_reads = n_row_tiles

    s2_precision = (lax.Precision.HIGHEST if mm_dtype == jnp.float32
                    else lax.Precision.DEFAULT)
    kernel = _make_stage2_kernel(resident_support=resident, k_tile=k_tile,
                                 use_acc=use_acc, precision=s2_precision)
    scratch = ([pltpu.VMEM((row_tile, fout_pad), jnp.float32)]
               if use_acc else [])

    out = pl.pallas_call(
        kernel,
        out_shape=jax.ShapeDtypeStruct((n_row_pad, fout_pad), out_dtype),
        grid_spec=pltpu.PrefetchScalarGridSpec(
            num_scalar_prefetch=0,
            grid=(n_row_tiles, n_k_tiles),
            in_specs=[
                pl.BlockSpec((row_tile, k_tile), lambda i, k: (i, k)),   # adj
                support_spec,                                            # support
                pl.BlockSpec((1, fout_pad), lambda i, k: (0, 0)),        # bias
            ],
            out_specs=pl.BlockSpec((row_tile, fout_pad), lambda i, k: (i, 0)),
            scratch_shapes=scratch,
        ),
        compiler_params=pltpu.CompilerParams(
            dimension_semantics=("parallel", "arbitrary"),
            vmem_limit_bytes=vmem_limit,
        ),
        cost_estimate=pl.CostEstimate(
            flops=2 * n_row_pad * n_col_pad * fout_pad,
            transcendentals=0,
            bytes_accessed=int(n_row_pad * n_col_pad * mm_isz
                               + support_reads * n_col_pad * fout_pad * mm_isz
                               + n_row_pad * fout_pad * out_isz),
        ),
    )(adjp, support, bp)

    return out[:n, :fout]


# ---------------------------------------------------------------------------
# Demo / self-test
# ---------------------------------------------------------------------------
if __name__ == "__main__":
    key = jax.random.PRNGKey(0)
    HI = lax.Precision.HIGHEST

    def init_params(kw, kb, fin, fout):
        # mirrors reset_parameters(): uniform(-stdv, stdv), stdv = 1/sqrt(fout)
        stdv = 1.0 / math.sqrt(fout)
        w = jax.random.uniform(kw, (fin, fout), jnp.float32, -stdv, stdv)
        b = jax.random.uniform(kb, (fout,), jnp.float32, -stdv, stdv)
        return w, b

    def reference(x, adj, w, b):
        support = jnp.dot(x, w, precision=HI)
        return jnp.dot(adj, support, precision=HI) + b

    # --- Test 1: tiny graph -> fused single-block path (exact f32) ----------
    n1, fin1, fout1 = 16, 8, 32
    k1, k2, k3, k4, key = jax.random.split(key, 5)
    w1, b1 = init_params(k3, k4, fin1, fout1)
    x1 = jax.random.normal(k1, (n1, fin1), jnp.float32)
    a1 = jax.random.uniform(k2, (n1, n1), jnp.float32)
    a1 = a1 / jnp.sum(a1, axis=1, keepdims=True)           # row-normalized adj
    ref1 = reference(x1, a1, w1, b1)
    out1 = jax.block_until_ready(graph_convolution(x1, a1, w1, b1))
    assert out1.shape == (n1, fout1)
    assert jnp.allclose(out1, ref1, atol=1e-5, rtol=1e-5), "fused path mismatch"

    # --- Test 2: two-stage path, bf16 adj stream, pre-padded adjacency ------
    n2, fin2, fout2 = 200, 64, 96
    k1, k2, k3, k4, key = jax.random.split(key, 5)
    w2, b2 = init_params(k3, k4, fin2, fout2)
    x2 = jax.random.normal(k1, (n2, fin2), jnp.float32)
    a2 = jax.random.uniform(k2, (n2, n2), jnp.float32)
    a2 = a2 / jnp.sum(a2, axis=1, keepdims=True)
    ref2 = reference(x2, a2, w2, b2)
    a2_prepped = prepare_adjacency(a2)        # pad + bf16 cast done ONCE
    out2 = jax.block_until_ready(graph_convolution(x2, a2_prepped, w2, b2))
    assert out2.shape == (n2, fout2)
    assert jnp.allclose(out2, ref2, atol=1e-2, rtol=1e-2), "two-stage mismatch"

    # --- Test 3: bf16 activations/output (exercises the acc-scratch kernel) --
    out3 = jax.block_until_ready(
        graph_convolution(x2.astype(jnp.bfloat16), a2, w2, b2,
                          allow_fused=False))
    assert out3.shape == (n2, fout2)
    assert jnp.allclose(out3.astype(jnp.float32), ref2, atol=3e-2, rtol=3e-2), \
        "bf16-output path mismatch"

    print("KERNEL_OK")
</pallas_src>

<mosaic_0001>
module attributes {stable_mosaic.version = 11 : i64} {
  func.func @_fused_kernel(%arg0: i32, %arg1: memref<16x8xf32, #tpu.memory_space<vmem>>, %arg2: memref<16x16xf32, #tpu.memory_space<vmem>>, %arg3: memref<8x128xf32, #tpu.memory_space<vmem>>, %arg4: memref<1x128xf32, #tpu.memory_space<vmem>>, %arg5: memref<16x128xf32, #tpu.memory_space<vmem>>) attributes {dimension_semantics = [#tpu.dimension_semantics<arbitrary>], iteration_bounds = array<i64: 1>, scalar_prefetch = 0 : i64, scratch_operands = 0 : i64, tpu.core_type = #tpu.core_type<tc>, window_params = [{pipeline_mode = #tpu.pipeline_mode<synchronous>, transform_indices = @transform_0, window_bounds = array<i64: 16, 8>}, {pipeline_mode = #tpu.pipeline_mode<synchronous>, transform_indices = @transform_1, window_bounds = array<i64: 16, 16>}, {pipeline_mode = #tpu.pipeline_mode<synchronous>, transform_indices = @transform_2, window_bounds = array<i64: 8, 128>}, {pipeline_mode = #tpu.pipeline_mode<synchronous>, transform_indices = @transform_3, window_bounds = array<i64: 1, 128>}, {pipeline_mode = #tpu.pipeline_mode<synchronous>, transform_indices = @transform_4, window_bounds = array<i64: 16, 128>}]} {
    %c0 = arith.constant 0 : index
    %c0_0 = arith.constant 0 : index
    %0 = vector.load %arg1[%c0, %c0_0] : memref<16x8xf32, #tpu.memory_space<vmem>>, vector<16x8xf32>
    %c0_1 = arith.constant 0 : index
    %c0_2 = arith.constant 0 : index
    %1 = vector.load %arg3[%c0_1, %c0_2] : memref<8x128xf32, #tpu.memory_space<vmem>>, vector<8x128xf32>
    %cst = arith.constant dense<0.000000e+00> : vector<16x128xf32>
    %2 = tpu.matmul %0, %1, %cst {dimension_numbers = #tpu.dot_dimension_numbers<[1], [0], [0], [1], [0, 0, 1, 1], [], []>, precision = #tpu.contract_precision<fp32>} : vector<16x8xf32>, vector<8x128xf32>, vector<16x128xf32> -> vector<16x128xf32>
    %c0_3 = arith.constant 0 : index
    %c0_4 = arith.constant 0 : index
    %3 = vector.load %arg2[%c0_3, %c0_4] : memref<16x16xf32, #tpu.memory_space<vmem>>, vector<16x16xf32>
    %cst_5 = arith.constant dense<0.000000e+00> : vector<16x128xf32>
    %4 = tpu.matmul %3, %2, %cst_5 {dimension_numbers = #tpu.dot_dimension_numbers<[1], [0], [0], [1], [0, 0, 1, 1], [], []>, precision = #tpu.contract_precision<fp32>} : vector<16x16xf32>, vector<16x128xf32>, vector<16x128xf32> -> vector<16x128xf32>
    %c0_6 = arith.constant 0 : index
    %c0_7 = arith.constant 0 : index
    %5 = vector.load %arg4[%c0_6, %c0_7] : memref<1x128xf32, #tpu.memory_space<vmem>>, vector<1x128xf32>
    %6 = vector.broadcast %5 : vector<1x128xf32> to vector<16x128xf32>
    %7 = arith.addf %4, %6 : vector<16x128xf32>
    %c0_8 = arith.constant 0 : index
    %c0_9 = arith.constant 0 : index
    %8 = vector.load %arg5[%c0_8, %c0_9] : memref<16x128xf32, #tpu.memory_space<vmem>>, vector<16x128xf32>
    tpu.vector_store %arg5[%c0_8, %c0_9], %7 {strides = array<i32>} : memref<16x128xf32, #tpu.memory_space<vmem>>, vector<16x128xf32>,
    return
  }
  func.func @transform_0(%arg0: i32) -> (i32, i32) {
    %c0_i32 = arith.constant 0 : i32
    %c0_i32_0 = arith.constant 0 : i32
    %c0_i32_1 = arith.constant 0 : i32
    return %c0_i32, %c0_i32_0 : i32, i32
  }
  func.func @transform_1(%arg0: i32) -> (i32, i32) {
    %c0_i32 = arith.constant 0 : i32
    %c0_i32_0 = arith.constant 0 : i32
    %c0_i32_1 = arith.constant 0 : i32
    return %c0_i32, %c0_i32_0 : i32, i32
  }
  func.func @transform_2(%arg0: i32) -> (i32, i32) {
    %c0_i32 = arith.constant 0 : i32
    %c0_i32_0 = arith.constant 0 : i32
    %c0_i32_1 = arith.constant 0 : i32
    return %c0_i32, %c0_i32_0 : i32, i32
  }
  func.func @transform_3(%arg0: i32) -> (i32, i32) {
    %c0_i32 = arith.constant 0 : i32
    %c0_i32_0 = arith.constant 0 : i32
    %c0_i32_1 = arith.constant 0 : i32
    return %c0_i32, %c0_i32_0 : i32, i32
  }
  func.func @transform_4(%arg0: i32) -> (i32, i32) {
    %c0_i32 = arith.constant 0 : i32
    %c0_i32_0 = arith.constant 0 : i32
    %c0_i32_1 = arith.constant 0 : i32
    return %c0_i32, %c0_i32_0 : i32, i32
  }
}

</mosaic_0001>

<bundles_post_ra>
// kernel: tpu_custom_call.1
= control target key start
LH: loop header
LB: loop body
LE: loop exit
PB: predicated region body
PF: predicated region fallthrough
CT: control target
= control target key end

     0   :  { %vm21_vm0 = vcmask 64512   ;;  %s1263_s0 = inlined_call_operand.vmem [shape: f32[16,8], index: 0, kind: input, shape index: {}]   ;;  %s1264_s1 = inlined_call_operand.vmem [shape: f32[16,16], index: 1, kind: input, shape index: {}]   ;;  %s1265_s2 = inlined_call_operand.vmem [shape: f32[8,128], index: 2, kind: input, shape index: {}]   ;;  %s1266_s3 = inlined_call_operand.vmem [shape: f32[1,128], index: 3, kind: input, shape index: {}]   ;;  %s1267_s4 = inlined_call_operand.hbm [shape: f32[16,128], index: 4, kind: output, shape index: {}]  }
   0x1   :  { %v20_v0 = vld [vmem:[%s1265_s2] sm:$0xff]  ;;  %v19_v2 = vld [vmem:[%s1263_s0 + $0x8] sm:$0xff] }
   0x2   :  { %v18_v1 = vld [vmem:[%s1263_s0] sm:$0xff]  ;;  %v59_v3 = vand.u32 4294901760, %v20_v0  ;;  %v26_v5 = vsel %vm21_vm0, %v19_v2, 0 }
   0x3   :  { %v23_v4 = vsel %vm21_vm0, %v18_v1, 0 }
   0x4   :  { %9 = vsyncpa [#allocation3], 0  ;;  %v94_v6 = vand.u32 4294901760, %v23_v4  ;;  %v104_v7 = vand.u32 4294901760, %v26_v5  ;;  %1096 = vmatprep.subr.mxu0 %v59_v3  ;;  %v146_v8 = vsub.f32 %v20_v0, %v59_v3  ;;  %v517_v20 = vld [vmem:[%s1264_s1] sm:$0xff]  ;;  %vm526_vm1 = vcmask 130048  }
   0x5   :  { %1097 = vmatpush3.msra.mxu0 %v59_v3  ;;  %v528_v21 = vsel %vm526_vm1, %v517_v20, 0  ;;  %v518_v27 = vld [vmem:[%s1264_s1 + $0x8] sm:$0xff]  ;;  %s1193_s24 = smov [#allocation2]  }
   0x6   :  { %v95_v9 = vsub.f32 %v23_v4, %v94_v6  ;;  %1103 = vmatprep.mubr.f32.mxu1 %v94_v6  ;;  %v105_v10 = vsub.f32 %v26_v5, %v104_v7  ;;  %v147_v11 = vand.u32 4294901760, %v146_v8  ;;  %1106 = vmatprep.subr.mxu0 %v146_v8  ;;  %v1233_v22 = vand.u32 4294901760, %v528_v21  ;;  %s1042_s25 = sshll.u32 %s1193_s24, 4  ;;  %s1043_s25 = int_to_ptr.vmem [resolvable:$true] %s1042_s25 }
   0x7   :  { %v531_v28 = vsel %vm526_vm1, %v518_v27, 0  ;;  %p1176_p1 = scmp.lt.s32.totalorder %s1043_s25, %s1043_s25 }
   0x8   :  { %v96_v12 = vand.u32 4294901760, %v95_v9  ;;  %v106_v13 = vand.u32 4294901760, %v105_v10  ;;  %v148_v14 = vsub.f32 %v146_v8, %v147_v11  ;;  %v1236_v23 = vsub.f32 %v528_v21, %v1233_v22 }
   0x9   :  { %v1246_v29 = vand.u32 4294901760, %v531_v28 }
   0xa   :  { %v97_v15 = vsub.f32 %v95_v9, %v96_v12  ;;  %v107_v16 = vsub.f32 %v105_v10, %v106_v13  ;;  %v149_v17 = vand.u32 4294901760, %v148_v14  ;;  %v602_v24 = vand.u32 4294901760, %v1236_v23 }
   0xb   :  { %v611_v35 = vsub.f32 %v531_v28, %v1246_v29 }
   0xc   :  { %v98_v18 = vand.u32 4294901760, %v97_v15  ;;  %v108_v19 = vand.u32 4294901760, %v107_v16  ;;  %1101 = vmatprep.subr.mxu1 %v149_v17  ;;  %v603_v25 = vsub.f32 %v1236_v23, %v602_v24 }
   0xd   :  { %1102 = vmatpush3.msra.mxu1 %v149_v17  ;;  %v612_v44 = vand.u32 4294901760, %v611_v35 }
   0xe   :  { %1098 = vmatprep.mubr.f32.mxu0 %v98_v18  ;;  %1104 = vmatmul.mubr.f32.vlgmr.msra.gmra.mxu1 %v104_v7  ;;  %v604_v26 = vand.u32 4294901760, %v603_v25 }
   0xf   :  { %1099 = vmatmul.mubr.f32.vlgmr.msra.gmra.mxu0 %v108_v19  ;;  %1111 = vmatprep.subr.mxu1 %v59_v3  ;;  %v613_v52 = vsub.f32 %v611_v35, %v612_v44 }
  0x10   :  { %1107 = vmatpush3.msra.mxu0 %v146_v8  ;;  %1108 = vmatprep.mubr.f32.mxu0 %v95_v9 }
  0x11   :  { %1112 = vmatpush3.msra.mxu1 %v59_v3  ;;  %1113 = vmatprep.mubr.f32.mxu1 %v96_v12  ;;  %v614_v58 = vand.u32 4294901760, %v613_v52 }
  0x12   :  { %1116 = vmatprep.subr.mxu0 %v147_v11  ;;  %1114 = vmatmul.mubr.f32.vlgmr.msra.gmra.mxu1 %v106_v13 }
  0x13   :  { %1109 = vmatmul.mubr.f32.vlgmr.msra.gmra.mxu0 %v105_v10  ;;  %1121 = vmatprep.subr.mxu1 %v59_v3 }
  0x14   :  { %1117 = vmatpush3.msra.mxu0 %v147_v11  ;;  %1118 = vmatprep.mubr.f32.mxu0 %v94_v6 }
  0x15   :  { %1122 = vmatpush3.msra.mxu1 %v59_v3  ;;  %1123 = vmatprep.mubr.f32.mxu1 %v94_v6  ;;  %v1053_v3 = vld [vmem:[%s1266_s3] ss:$0 sm:$0xff]  ;;  %s1171_s3 = scalar_lea.vmem %s1043_s25, 256 }
  0x16   :  { %1124 = vmatmul.mubr.f32.vlgmr.msra.gmra.mxu1 %v104_v7  ;;  %p1172_p0 = scmp.ne.s32.totalorder %s1043_s25, %s1171_s3  ;;  %p1177_p2 = scmp.lt.s32.totalorder %s1171_s3, %s1171_s3 }
  0x17   :  { %1119 = vmatmul.mubr.f32.vlgmr.msra.gmra.mxu0 %v104_v7  ;;  %1137 = vmatprep.mubr.f32.mxu1 %v1233_v22 }
  0x18   :  { %1130 = vmatprep.mubr.f32.mxu0 %v604_v26  ;;  %p1178_p3 = por %p1177_p2, %p1176_p1 }
  0x1a   :  { %p1179_p4 = pnand %p1178_p3, %p1172_p0 }
  0xce   :  { %v1105_v31 = vpop.f32.mrf.mxu1 }
  0xcf   :  { %v1100_v30 = vpop.f32.mrf.mxu0 }
  0xd0   :  { %v186_v33 = vpop.f32.mrf.mxu1  ;;  %v193_v34 = vadd.f32 %v1105_v31, %v1100_v30 }
  0xd1   :  { %v100_v32 = vpop.f32.mrf.mxu0 }
  0xd2   :  { %v1115_v37 = vpop.f32.mrf.mxu1  ;;  %v187_v38 = vadd.f32 %v186_v33, %v100_v32 }
  0xd3   :  { %v1110_v36 = vpop.f32.mrf.mxu0 }
  0xd4   :  { %v274_v39 = vadd.f32 %v1110_v36, %v193_v34  ;;  %v347_v41 = vpop.f32.mrf.mxu1 }
  0xd5   :  { %v266_v40 = vpop.f32.mrf.mxu0 }
  0xd6   :  { %v356_v42 = vadd.f32 %v1115_v37, %v274_v39  ;;  %v267_v43 = vadd.f32 %v266_v40, %v187_v38  ;;  %v1125_v46 = vpop.f32.mrf.mxu1 }
  0xd7   :  { %v1120_v45 = vpop.f32.mrf.mxu0 }
  0xd8   :  { %v348_v47 = vadd.f32 %v347_v41, %v267_v43  ;;  %v436_v48 = vadd.f32 %v1120_v45, %v356_v42  ;;  %v507_v53 = vpop.f32.mrf.mxu1 }
  0xd9   :  { %v429_v49 = vpop.f32.mrf.mxu0 }
  0xda   :  { %v514_v50 = vadd.f32 %v1125_v46, %v436_v48  ;;  %v430_v51 = vadd.f32 %v429_v49, %v348_v47 }
  0xdc   :  { %v562_v54 = vand.u32 4294901760, %v514_v50  ;;  %v508_v55 = vadd.f32 %v507_v53, %v430_v51 }
  0xde   :  { %v650_v56 = vsub.f32 %v514_v50, %v562_v54  ;;  %v565_v57 = vand.u32 4294901760, %v508_v55  ;;  %1126 = vmatprep.subr.mxu0 %v562_v54 }
  0xdf   :  { %1127 = vmatpush3.msra.mxu0 %v562_v54 }
  0xe0   :  { %v657_v59 = vsub.f32 %v508_v55, %v565_v57  ;;  %1128 = vmatprep.subr.mxu0 %v565_v57  ;;  %v651_v60 = vand.u32 4294901760, %v650_v56 }
  0xe1   :  { %1129 = vmatpush3.msra.mxu0 %v565_v57 }
  0xe2   :  { %1140 = vmatprep.subr.mxu0 %v650_v56  ;;  %1131 = vmatmul.mubr.f32.vlgmr.msra.gmra.mxu0 %v614_v58  ;;  %v652_v61 = vsub.f32 %v650_v56, %v651_v60  ;;  %v658_v62 = vand.u32 4294901760, %v657_v59 }
  0xe3   :  { %1141 = vmatpush3.msra.mxu0 %v650_v56  ;;  %1144 = vmatprep.mubr.f32.mxu0 %v1236_v23 }
  0xe4   :  { %1142 = vmatprep.subr.mxu0 %v657_v59  ;;  %v653_v63 = vand.u32 4294901760, %v652_v61  ;;  %v659_v0 = vsub.f32 %v657_v59, %v658_v62 }
  0xe5   :  { %1143 = vmatpush3.msra.mxu0 %v657_v59 }
  0xe6   :  { %1133 = vmatprep.subr.mxu1 %v653_v63  ;;  %1154 = vmatprep.subr.mxu0 %v651_v60  ;;  %v660_v1 = vand.u32 4294901760, %v659_v0 }
  0xe7   :  { %1134 = vmatpush3.msra.mxu1 %v653_v63  ;;  %1145 = vmatmul.mubr.f32.vlgmr.msra.gmra.mxu0 %v611_v35 }
  0xe8   :  { %1155 = vmatpush3.msra.mxu0 %v651_v60  ;;  %1135 = vmatprep.subr.mxu1 %v660_v1 }
  0xe9   :  { %1156 = vmatprep.subr.mxu0 %v658_v62  ;;  %1136 = vmatpush3.msra.mxu1 %v660_v1 }
  0xea   :  { %1157 = vmatpush3.msra.mxu0 %v658_v62  ;;  %1138 = vmatmul.mubr.f32.vlgmr.msra.gmra.mxu1 %v1246_v29 }
  0xeb   :  { %1147 = vmatprep.subr.mxu1 %v562_v54  ;;  %1151 = vmatprep.mubr.f32.mxu1 %v602_v24 }
  0xec   :  { %1148 = vmatpush3.msra.mxu1 %v562_v54  ;;  %1158 = vmatprep.mubr.f32.mxu0 %v1233_v22 }
  0xed   :  { %1149 = vmatprep.subr.mxu1 %v565_v57  ;;  %1159 = vmatmul.mubr.f32.vlgmr.msra.gmra.mxu0 %v1246_v29 }
  0xee   :  { %1150 = vmatpush3.msra.mxu1 %v565_v57 }
  0xef   :  { %1152 = vmatmul.mubr.f32.vlgmr.msra.gmra.mxu1 %v612_v44  ;;  %1161 = vmatprep.subr.mxu1 %v562_v54 }
  0xf0   :  { %1162 = vmatpush3.msra.mxu1 %v562_v54  ;;  %1165 = vmatprep.mubr.f32.mxu1 %v1233_v22 }
  0xf1   :  { %1163 = vmatprep.subr.mxu1 %v565_v57 }
  0xf2   :  { %1164 = vmatpush3.msra.mxu1 %v565_v57 }
  0xf3   :  { %1166 = vmatmul.mubr.f32.vlgmr.msra.gmra.mxu1 %v1246_v29 }
 0x1a2   :  { %v1132_v2 = vpop.f32.mrf.mxu0 }
 0x1a3   :  { %v617_v5 = vadd.f32 %v1132_v2, %v1053_v3 }
 0x1a4   :  { %v606_v4 = vpop.f32.mrf.mxu0 }
 0x1a5   :  { %v607_v8 = vadd.f32 %v1053_v3, %v606_v4 }
 0x1a7   :  { %v1146_v6 = vpop.f32.mrf.mxu0 }
 0x1a9   :  { %v779_v10 = vpop.f32.mrf.mxu0 }
 0x1aa   :  { %v1139_v7 = vpop.f32.mrf.mxu1 }
 0x1ab   :  { %v704_v9 = vadd.f32 %v1139_v7, %v617_v5 }
 0x1ac   :  { %v697_v11 = vpop.f32.mrf.mxu1 }
 0x1ad   :  { %v787_v12 = vadd.f32 %v1146_v6, %v704_v9  ;;  %v698_v13 = vadd.f32 %v697_v11, %v607_v8  ;;  %v1160_v16 = vpop.f32.mrf.mxu0 }
 0x1af   :  { %v780_v14 = vadd.f32 %v779_v10, %v698_v13  ;;  %v1153_v15 = vpop.f32.mrf.mxu1  ;;  %v946_v21 = vpop.f32.mrf.mxu0 }
 0x1b0   :  { %v870_v17 = vadd.f32 %v1153_v15, %v787_v12 }
 0x1b1   :  { %v861_v18 = vpop.f32.mrf.mxu1 }
 0x1b2   :  { %v953_v19 = vadd.f32 %v1160_v16, %v870_v17  ;;  %v862_v20 = vadd.f32 %v861_v18, %v780_v14 }
 0x1b3   :  { %v1167_v22 = vpop.f32.mrf.mxu1 }
 0x1b4   :  { %v947_v23 = vadd.f32 %v946_v21, %v862_v20  ;;  %v1032_v24 = vadd.f32 %v1167_v22, %v953_v19 }
 0x1b5   :  { %v1025_v25 = vpop.f32.mrf.mxu1 }
 0x1b6   :  { %1036 = vst [vmem:[#allocation2 + $0x8] sm:$0xff] %v1032_v24  ;;  %v1026_v26 = vadd.f32 %v1025_v25, %v947_v23 }
 0x1b8   :  { %1035 = vst [vmem:[#allocation2] sm:$0xff] %v1026_v26 }
 0x1b9   :  { %1182 = shalt.err (!%p1179_p4)
}
 0x1ba   :  { %s1194_s26 = smov 128   ;;  %s1195_s27 = smov 8  }
 0x1bb   :  { %1048 = dma.vmem_to_hbm [thread:$0]  %s1043_s25, 256, %s1267_s4, [#allocation3], %s1194_s26, %s1194_s26, %s1195_s27  }
 0x1bc   :  { %1191 = dma.done.wait [#allocation3], 256  }
 0x1bd   :  { %1192 = vsyncadd [#allocation3], 4294967040 }
 0x1be   :  { %1052 = vsyncpa [#allocation3], 1 }

</bundles_post_ra>
